<compile_context>
chip_gen: v6e
topology: v6e:2x2x1
jax: 0.10.0
libtpu: 0.0.40
codegen_flags: <defaults>
</compile_context>

<pallas_src>
import jax
import jax.numpy as jnp
from jax.experimental import pallas as pl
from jax.experimental.pallas import tpu as pltpu

HIDDEN = 128        # hidden width of fc1 / fc2
HEAD_WIDTH = 128    # lane-dense fused mu/sigma head output width (>= 2 * action_dim)


def _round_up(n, m):
    return ((n + m - 1) // m) * m


def _cdiv(a, b):
    return -(-a // b)


def _choose_batch_tiling(B, max_batch_tile=2048, sublane=8, even_grid=True):
    """Pick (tile, padded_batch, n_tiles):
       - tile is a multiple of 8 (sublane) and <= max_batch_tile,
       - n_tiles is even (>=2) whenever the padded batch is >= 16 rows (v7x megacore),
       - padding waste is < one sublane group per tile."""
    b_min = _round_up(max(B, sublane), sublane)
    n_tiles = max(1, _cdiv(b_min, max_batch_tile))
    if even_grid and b_min >= 2 * sublane and n_tiles % 2 == 1:
        n_tiles += 1
    tb = _round_up(_cdiv(b_min, n_tiles), sublane)
    b_pad = tb * n_tiles
    return tb, b_pad, n_tiles


def make_actor_kernel(action_dim):
    def actor_kernel(x_ref, w1_ref, b1_ref, w2_ref, b2_ref, wh_ref, bh_ref, out_ref):
        # fc1 + relu  (bf16 MXU operands, f32 accumulation)
        x_bf = x_ref[...].astype(jnp.bfloat16)
        x1 = jnp.dot(x_bf, w1_ref[...], preferred_element_type=jnp.float32) + b1_ref[...]
        x1 = jnp.maximum(x1, 0.0)
        x1_bf = x1.astype(jnp.bfloat16)

        # fc2 + relu
        x2 = jnp.dot(x1_bf, w2_ref[...], preferred_element_type=jnp.float32) + b2_ref[...]
        x2 = jnp.maximum(x2, 0.0)
        x2_bf = x2.astype(jnp.bfloat16)

        # Fused head: single K=256 matmul.
        #   rows [0:128)  of wh consume x2  (mu weights, lanes [0:A))
        #   rows [128:256) of wh consume x1 (sigma weights, lanes [A:2A))
        xcat = jnp.concatenate([x2_bf, x1_bf], axis=-1)            # (tb, 256) bf16
        head = jnp.dot(xcat, wh_ref[...],
                       preferred_element_type=jnp.float32) + bh_ref[...]   # (tb, 128) f32

        # Activations in f32 (EUP path; v5e-safe). Per-lane select mu vs sigma.
        mu_act = jnp.tanh(head) * 2.0
        # PyTorch softplus (beta=1, threshold=20): linear above threshold for stability.
        sp = jnp.where(head > 20.0, head,
                       jnp.log1p(jnp.exp(jnp.minimum(head, 20.0))))
        sig_act = jnp.maximum(sp, 1e-5)

        lane = jax.lax.broadcasted_iota(jnp.int32, head.shape, 1)
        out_ref[...] = jnp.where(lane < action_dim, mu_act, sig_act).astype(out_ref.dtype)

    return actor_kernel


def actor_forward(x, kp, action_dim, max_batch_tile=2048, out_dtype=jnp.float32,
                  return_slab=False):
    """x: (B, state_dim) float32. kp: kernel params from prepare_kernel_params().
    out_dtype=jnp.bfloat16 halves output writeback for large B (slight extra rounding).
    return_slab=True returns the lane-dense (B, 128) slab (no wrapper slicing pass)."""
    B, S = x.shape
    assert 2 * action_dim <= HEAD_WIDTH, "fused head assumes 2*action_dim <= 128"

    tb, b_pad, n_tiles = _choose_batch_tiling(B, max_batch_tile)
    if b_pad != B:
        x = jnp.pad(x, ((0, b_pad - B), (0, 0)))
    grid = (n_tiles,)

    out = pl.pallas_call(
        make_actor_kernel(action_dim),
        out_shape=jax.ShapeDtypeStruct((b_pad, HEAD_WIDTH), out_dtype),
        grid_spec=pltpu.PrefetchScalarGridSpec(
            num_scalar_prefetch=0,
            grid=grid,
            in_specs=[
                # activation stream: one batch tile per grid step
                pl.BlockSpec((tb, S), lambda i: (i, 0)),
                # weights / biases: VMEM-resident across the batch grid
                pl.BlockSpec((S, HIDDEN), lambda i: (0, 0)),
                pl.BlockSpec((1, HIDDEN), lambda i: (0, 0)),
                pl.BlockSpec((HIDDEN, HIDDEN), lambda i: (0, 0)),
                pl.BlockSpec((1, HIDDEN), lambda i: (0, 0)),
                pl.BlockSpec((2 * HIDDEN, HEAD_WIDTH), lambda i: (0, 0)),
                pl.BlockSpec((1, HEAD_WIDTH), lambda i: (0, 0)),
            ],
            out_specs=pl.BlockSpec((tb, HEAD_WIDTH), lambda i: (i, 0)),
        ),
        compiler_params=pltpu.CompilerParams(
            dimension_semantics=("parallel",),   # grid kept even so v7x shards 2 TCs
        ),
    )(x, kp["w1"], kp["b1"], kp["w2"], kp["b2"], kp["w_head"], kp["b_head"])

    if return_slab:
        return out[:B]   # lanes [0:A)=mu, [A:2A)=sigma
    mu = out[:B, :action_dim]
    sigma = out[:B, action_dim:2 * action_dim]
    return mu, sigma


def init_params(key, state_dim, action_dim, hidden=HIDDEN):
    """Deterministic init mimicking nn.Linear default U(-1/sqrt(fan_in), 1/sqrt(fan_in)).
    Weights stored as (in, out) — i.e. PyTorch W.T — biases as (1, out). All float32."""
    def linear(k, fan_in, fan_out):
        kw, kb = jax.random.split(k)
        bound = 1.0 / jnp.sqrt(fan_in)
        w = jax.random.uniform(kw, (fan_in, fan_out), jnp.float32, -bound, bound)
        b = jax.random.uniform(kb, (1, fan_out), jnp.float32, -bound, bound)
        return w, b

    k1, k2, k3, k4 = jax.random.split(key, 4)
    w1, b1 = linear(k1, state_dim, hidden)
    w2, b2 = linear(k2, hidden, hidden)
    wmu, bmu = linear(k3, hidden, action_dim)
    wsig, bsig = linear(k4, hidden, action_dim)
    return dict(w1=w1, b1=b1, w2=w2, b2=b2,
                wmu=wmu, bmu=bmu, wsig=wsig, bsig=bsig)


def prepare_kernel_params(p, action_dim):
    """bf16 MXU weights; mu/sigma heads stacked into one (256, 128) zero-padded
    lane-dense weight so the kernel runs a single K=256 head matmul (host-side, once)."""
    A = action_dim
    w_head = jnp.zeros((2 * HIDDEN, HEAD_WIDTH), jnp.bfloat16)
    w_head = w_head.at[:HIDDEN, :A].set(p["wmu"].astype(jnp.bfloat16))          # x2 -> mu
    w_head = w_head.at[HIDDEN:, A:2 * A].set(p["wsig"].astype(jnp.bfloat16))    # x1 -> sigma
    b_head = (jnp.zeros((1, HEAD_WIDTH), jnp.float32)
              .at[:, :A].set(p["bmu"])
              .at[:, A:2 * A].set(p["bsig"]))
    return dict(
        w1=p["w1"].astype(jnp.bfloat16), b1=p["b1"],
        w2=p["w2"].astype(jnp.bfloat16), b2=p["b2"],
        w_head=w_head, b_head=b_head,
    )


def actor_reference_bf16(x, p):
    """Pure-JAX reference of the math the kernel performs
    (bf16 matmul operands, f32 accumulation, f32 activations)."""
    def mm(a, w):
        return jnp.dot(a.astype(jnp.bfloat16), w.astype(jnp.bfloat16),
                       preferred_element_type=jnp.float32)
    x1 = jax.nn.relu(mm(x, p["w1"]) + p["b1"])
    x2 = jax.nn.relu(mm(x1, p["w2"]) + p["b2"])
    mu = jnp.tanh(mm(x2, p["wmu"]) + p["bmu"]) * 2.0
    sigma = jnp.clip(jax.nn.softplus(mm(x1, p["wsig"]) + p["bsig"]), 1e-5, None)
    return mu, sigma


def actor_reference_f32(x, p):
    """Full-f32 reference replicating the PyTorch forward (drift sanity check)."""
    x1 = jax.nn.relu(x @ p["w1"] + p["b1"])
    x2 = jax.nn.relu(x1 @ p["w2"] + p["b2"])
    mu = jnp.tanh(x2 @ p["wmu"] + p["bmu"]) * 2.0
    sigma = jnp.clip(jax.nn.softplus(x1 @ p["wsig"] + p["bsig"]), 1e-5, None)
    return mu, sigma


if __name__ == "__main__":
    batch, state_dim, action_dim = 8, 16, 2

    key = jax.random.PRNGKey(0)
    kx, kp_key = jax.random.split(key)
    x = jax.random.normal(kx, (batch, state_dim), dtype=jnp.float32)

    params = init_params(kp_key, state_dim, action_dim)
    kparams = prepare_kernel_params(params, action_dim)

    mu, sigma = jax.block_until_ready(actor_forward(x, kparams, action_dim))

    # Exact-math check (same bf16-operand / f32-accumulate recipe as the kernel).
    mu_bf, sig_bf = actor_reference_bf16(x, params)
    assert jnp.allclose(mu, mu_bf, atol=1e-3, rtol=1e-3), "mu mismatch vs bf16 reference"
    assert jnp.allclose(sigma, sig_bf, atol=1e-3, rtol=1e-3), "sigma mismatch vs bf16 reference"

    # Loose drift check vs the original f32 PyTorch semantics (bf16 weight quantization only).
    mu_f32, sig_f32 = actor_reference_f32(x, params)
    assert jnp.allclose(mu, mu_f32, atol=5e-2, rtol=5e-2), "mu drifted from f32 reference"
    assert jnp.allclose(sigma, sig_f32, atol=5e-2, rtol=5e-2), "sigma drifted from f32 reference"

    assert mu.shape == (batch, action_dim) and sigma.shape == (batch, action_dim)

    # Exercise the tiling chooser once with a multi-tile batch (even grid, minimal padding).
    x_big = jax.random.normal(kx, (520, state_dim), dtype=jnp.float32)
    mu_b, sig_b = jax.block_until_ready(
        actor_forward(x_big, kparams, action_dim, max_batch_tile=512))
    mu_b_ref, sig_b_ref = actor_reference_bf16(x_big, params)
    assert jnp.allclose(mu_b, mu_b_ref, atol=1e-3, rtol=1e-3), "large-batch mu mismatch"
    assert jnp.allclose(sig_b, sig_b_ref, atol=1e-3, rtol=1e-3), "large-batch sigma mismatch"

    print("KERNEL_OK")
</pallas_src>

<mosaic_0001>
module attributes {stable_mosaic.version = 11 : i64} {
  func.func @actor_kernel(%arg0: i32, %arg1: memref<8x16xf32, #tpu.memory_space<vmem>>, %arg2: memref<16x128xbf16, #tpu.memory_space<vmem>>, %arg3: memref<1x128xf32, #tpu.memory_space<vmem>>, %arg4: memref<128x128xbf16, #tpu.memory_space<vmem>>, %arg5: memref<1x128xf32, #tpu.memory_space<vmem>>, %arg6: memref<256x128xbf16, #tpu.memory_space<vmem>>, %arg7: memref<1x128xf32, #tpu.memory_space<vmem>>, %arg8: memref<8x128xf32, #tpu.memory_space<vmem>>) attributes {dimension_semantics = [#tpu.dimension_semantics<parallel>], iteration_bounds = array<i64: 1>, scalar_prefetch = 0 : i64, scratch_operands = 0 : i64, tpu.core_type = #tpu.core_type<tc>, window_params = [{transform_indices = @transform_0, window_bounds = array<i64: 8, 16>}, {pipeline_mode = #tpu.pipeline_mode<synchronous>, transform_indices = @transform_1, window_bounds = array<i64: 16, 128>}, {pipeline_mode = #tpu.pipeline_mode<synchronous>, transform_indices = @transform_2, window_bounds = array<i64: 1, 128>}, {pipeline_mode = #tpu.pipeline_mode<synchronous>, transform_indices = @transform_3, window_bounds = array<i64: 128, 128>}, {pipeline_mode = #tpu.pipeline_mode<synchronous>, transform_indices = @transform_4, window_bounds = array<i64: 1, 128>}, {pipeline_mode = #tpu.pipeline_mode<synchronous>, transform_indices = @transform_5, window_bounds = array<i64: 256, 128>}, {pipeline_mode = #tpu.pipeline_mode<synchronous>, transform_indices = @transform_6, window_bounds = array<i64: 1, 128>}, {transform_indices = @transform_7, window_bounds = array<i64: 8, 128>}]} {
    %c0 = arith.constant 0 : index
    %c0_0 = arith.constant 0 : index
    %0 = vector.load %arg1[%c0, %c0_0] : memref<8x16xf32, #tpu.memory_space<vmem>>, vector<8x16xf32>
    %1 = arith.truncf %0 : vector<8x16xf32> to vector<8x16xbf16>
    %c0_1 = arith.constant 0 : index
    %c0_2 = arith.constant 0 : index
    %2 = vector.load %arg2[%c0_1, %c0_2] : memref<16x128xbf16, #tpu.memory_space<vmem>>, vector<16x128xbf16>
    %cst = arith.constant dense<0.000000e+00> : vector<8x128xf32>
    %3 = tpu.matmul %1, %2, %cst {dimension_numbers = #tpu.dot_dimension_numbers<[1], [0], [0], [1], [0, 0, 1, 1], [], []>} : vector<8x16xbf16>, vector<16x128xbf16>, vector<8x128xf32> -> vector<8x128xf32>
    %c0_3 = arith.constant 0 : index
    %c0_4 = arith.constant 0 : index
    %4 = vector.load %arg3[%c0_3, %c0_4] : memref<1x128xf32, #tpu.memory_space<vmem>>, vector<1x128xf32>
    %5 = vector.broadcast %4 : vector<1x128xf32> to vector<8x128xf32>
    %6 = arith.addf %3, %5 : vector<8x128xf32>
    %cst_5 = arith.constant 0.000000e+00 : f32
    %7 = vector.broadcast %cst_5 : f32 to vector<8x128xf32>
    %8 = arith.maximumf %6, %7 : vector<8x128xf32>
    %9 = arith.truncf %8 : vector<8x128xf32> to vector<8x128xbf16>
    %c0_6 = arith.constant 0 : index
    %c0_7 = arith.constant 0 : index
    %10 = vector.load %arg4[%c0_6, %c0_7] : memref<128x128xbf16, #tpu.memory_space<vmem>>, vector<128x128xbf16>
    %cst_8 = arith.constant dense<0.000000e+00> : vector<8x128xf32>
    %11 = tpu.matmul %9, %10, %cst_8 {dimension_numbers = #tpu.dot_dimension_numbers<[1], [0], [0], [1], [0, 0, 1, 1], [], []>} : vector<8x128xbf16>, vector<128x128xbf16>, vector<8x128xf32> -> vector<8x128xf32>
    %c0_9 = arith.constant 0 : index
    %c0_10 = arith.constant 0 : index
    %12 = vector.load %arg5[%c0_9, %c0_10] : memref<1x128xf32, #tpu.memory_space<vmem>>, vector<1x128xf32>
    %13 = vector.broadcast %12 : vector<1x128xf32> to vector<8x128xf32>
    %14 = arith.addf %11, %13 : vector<8x128xf32>
    %cst_11 = arith.constant 0.000000e+00 : f32
    %15 = vector.broadcast %cst_11 : f32 to vector<8x128xf32>
    %16 = arith.maximumf %14, %15 : vector<8x128xf32>
    %17 = arith.truncf %16 : vector<8x128xf32> to vector<8x128xbf16>
    %18 = tpu.concatenate %17, %9 in 1 : vector<8x128xbf16>, vector<8x128xbf16> -> vector<8x256xbf16>
    %c0_12 = arith.constant 0 : index
    %c0_13 = arith.constant 0 : index
    %19 = vector.load %arg6[%c0_12, %c0_13] : memref<256x128xbf16, #tpu.memory_space<vmem>>, vector<256x128xbf16>
    %cst_14 = arith.constant dense<0.000000e+00> : vector<8x128xf32>
    %20 = tpu.matmul %18, %19, %cst_14 {dimension_numbers = #tpu.dot_dimension_numbers<[1], [0], [0], [1], [0, 0, 1, 1], [], []>} : vector<8x256xbf16>, vector<256x128xbf16>, vector<8x128xf32> -> vector<8x128xf32>
    %c0_15 = arith.constant 0 : index
    %c0_16 = arith.constant 0 : index
    %21 = vector.load %arg7[%c0_15, %c0_16] : memref<1x128xf32, #tpu.memory_space<vmem>>, vector<1x128xf32>
    %22 = vector.broadcast %21 : vector<1x128xf32> to vector<8x128xf32>
    %23 = arith.addf %20, %22 : vector<8x128xf32>
    %24 = math.tanh %23 : vector<8x128xf32>
    %cst_17 = arith.constant 2.000000e+00 : f32
    %25 = vector.broadcast %cst_17 : f32 to vector<8x128xf32>
    %26 = arith.mulf %24, %25 : vector<8x128xf32>
    %cst_18 = arith.constant 2.000000e+01 : f32
    %27 = vector.broadcast %cst_18 : f32 to vector<8x128xf32>
    %28 = arith.cmpf ogt, %23, %27 : vector<8x128xf32>
    %cst_19 = arith.constant 2.000000e+01 : f32
    %29 = vector.broadcast %cst_19 : f32 to vector<8x128xf32>
    %30 = arith.minimumf %23, %29 : vector<8x128xf32>
    %31 = math.exp %30 : vector<8x128xf32>
    %32 = math.log1p %31 : vector<8x128xf32>
    %33 = arith.select %28, %23, %32 : vector<8x128xi1>, vector<8x128xf32>
    %cst_20 = arith.constant 9.99999974E-6 : f32
    %34 = vector.broadcast %cst_20 : f32 to vector<8x128xf32>
    %35 = arith.maximumf %33, %34 : vector<8x128xf32>
    %36 = tpu.iota {dimensions = array<i32: 1>} : vector<8x128xi32>
    %c2_i32 = arith.constant 2 : i32
    %37 = vector.broadcast %c2_i32 : i32 to vector<8x128xi32>
    %38 = arith.cmpi slt, %36, %37 : vector<8x128xi32>
    %39 = arith.select %38, %26, %35 : vector<8x128xi1>, vector<8x128xf32>
    %c0_21 = arith.constant 0 : index
    %c0_22 = arith.constant 0 : index
    %40 = vector.load %arg8[%c0_21, %c0_22] : memref<8x128xf32, #tpu.memory_space<vmem>>, vector<8x128xf32>
    tpu.vector_store %arg8[%c0_21, %c0_22], %39 {strides = array<i32>} : memref<8x128xf32, #tpu.memory_space<vmem>>, vector<8x128xf32>,
    return
  }
  func.func @transform_0(%arg0: i32) -> (i32, i32) {
    %c0_i32 = arith.constant 0 : i32
    %c0_i32_0 = arith.constant 0 : i32
    return %arg0, %c0_i32 : i32, i32
  }
  func.func @transform_1(%arg0: i32) -> (i32, i32) {
    %c0_i32 = arith.constant 0 : i32
    %c0_i32_0 = arith.constant 0 : i32
    %c0_i32_1 = arith.constant 0 : i32
    return %c0_i32, %c0_i32_0 : i32, i32
  }
  func.func @transform_2(%arg0: i32) -> (i32, i32) {
    %c0_i32 = arith.constant 0 : i32
    %c0_i32_0 = arith.constant 0 : i32
    %c0_i32_1 = arith.constant 0 : i32
    return %c0_i32, %c0_i32_0 : i32, i32
  }
  func.func @transform_3(%arg0: i32) -> (i32, i32) {
    %c0_i32 = arith.constant 0 : i32
    %c0_i32_0 = arith.constant 0 : i32
    %c0_i32_1 = arith.constant 0 : i32
    return %c0_i32, %c0_i32_0 : i32, i32
  }
  func.func @transform_4(%arg0: i32) -> (i32, i32) {
    %c0_i32 = arith.constant 0 : i32
    %c0_i32_0 = arith.constant 0 : i32
    %c0_i32_1 = arith.constant 0 : i32
    return %c0_i32, %c0_i32_0 : i32, i32
  }
  func.func @transform_5(%arg0: i32) -> (i32, i32) {
    %c0_i32 = arith.constant 0 : i32
    %c0_i32_0 = arith.constant 0 : i32
    %c0_i32_1 = arith.constant 0 : i32
    return %c0_i32, %c0_i32_0 : i32, i32
  }
  func.func @transform_6(%arg0: i32) -> (i32, i32) {
    %c0_i32 = arith.constant 0 : i32
    %c0_i32_0 = arith.constant 0 : i32
    %c0_i32_1 = arith.constant 0 : i32
    return %c0_i32, %c0_i32_0 : i32, i32
  }
  func.func @transform_7(%arg0: i32) -> (i32, i32) {
    %c0_i32 = arith.constant 0 : i32
    %c0_i32_0 = arith.constant 0 : i32
    return %arg0, %c0_i32 : i32, i32
  }
}

</mosaic_0001>

<bundles_post_ra>
// kernel: tpu_custom_call.1
= control target key start
LH: loop header
LB: loop body
LE: loop exit
PB: predicated region body
PF: predicated region fallthrough
CT: control target
= control target key end

     0   :  { %12 = vsyncpa [#allocation3], 0  ;;  %s789_s0 = inlined_call_operand.hbm [shape: f32[8,16], index: 0, kind: input, shape index: {}]   ;;  %s790_s1 = inlined_call_operand.hbm [shape: bf16[16,128], index: 1, kind: input, shape index: {}]   ;;  %s791_s2 = inlined_call_operand.vmem [shape: f32[1,128], index: 2, kind: input, shape index: {}]   ;;  %s792_s3 = inlined_call_operand.hbm [shape: bf16[128,128], index: 3, kind: input, shape index: {}]   ;;  %s793_s4 = inlined_call_operand.vmem [shape: f32[1,128], index: 4, kind: input, shape index: {}]   ;;  %s794_s5 = inlined_call_operand.hbm [shape: bf16[256,128], index: 5, kind: input, shape index: {}]   ;;  %s795_s6 = inlined_call_operand.vmem [shape: f32[1,128], index: 6, kind: input, shape index: {}]   ;;  %s796_s7 = inlined_call_operand.hbm [shape: f32[8,128], index: 7, kind: output, shape index: {}]  }
   0x1   :  { %13 = vsyncpa [#allocation6], 0 }
   0x2   :  { %14 = vsyncpa [#allocation9], 0 }
   0x3   :  { %15 = vsyncpa [#allocation4], 0  ;;  %s707_s24 = smov [#allocation5]  }
   0x4   :  { %s31_s25 = sshll.u32 %s707_s24, 4  ;;  %s32_s25 = int_to_ptr.vmem [resolvable:$true] %s31_s25 }
   0x5   :  { %s607_s26 = scalar_lea.vmem %s32_s25, 128  ;;  %p612_p1 = scmp.lt.s32.totalorder %s32_s25, %s32_s25 }
   0x6   :  { %p608_p0 = scmp.ne.s32.totalorder %s32_s25, %s607_s26  ;;  %p613_p2 = scmp.lt.s32.totalorder %s607_s26, %s607_s26 }
   0x8   :  { %p614_p3 = por %p613_p2, %p612_p1 }
   0xa   :  { %p615_p4 = pnand %p614_p3, %p608_p0 }
   0xc   :  { %618 = shalt.err (!%p615_p4)
}
   0xd   :  { %s708_s27 = smov 64   ;;  %s709_s28 = smov 4  }
   0xe   :  { %37 = dma.hbm_to_vmem [thread:$0]  %s790_s1, 128, %s32_s25, [#allocation6], %s708_s27, %s708_s27, %s709_s28  }
   0xf   :  { %s710_s8 = smov [#allocation2]   ;;  %s711_s10 = smov [#allocation7]  }
  0x10   :  { %s22_s9 = sshll.u32 %s710_s8, 4  ;;  %s45_s11 = sshll.u32 %s711_s10, 4  ;;  %s23_s9 = int_to_ptr.vmem [resolvable:$true] %s22_s9  ;;  %s46_s11 = int_to_ptr.vmem [resolvable:$true] %s45_s11 }
  0x11   :  { %s627_s12 = scalar_lea.vmem %s23_s9, 128  ;;  %p632_p6 = scmp.lt.s32.totalorder %s23_s9, %s23_s9 }
  0x12   :  { %p628_p5 = scmp.ne.s32.totalorder %s23_s9, %s627_s12  ;;  %p633_p7 = scmp.lt.s32.totalorder %s627_s12, %s627_s12 }
  0x14   :  { %p634_p8 = por %p633_p7, %p632_p6 }
  0x16   :  { %p635_p9 = pnand %p634_p8, %p628_p5 }
  0x18   :  { %638 = shalt.err (!%p635_p9)
}
  0x19   :  { %25 = dma.hbm_to_vmem [thread:$0]  %s789_s0, 128, %s23_s9, [#allocation3]  }
  0x1a   :  { %s647_s15 = scalar_lea.vmem %s46_s11, 1024  ;;  %p652_p11 = scmp.lt.s32.totalorder %s46_s11, %s46_s11 }
  0x1b   :  { %p648_p10 = scmp.ne.s32.totalorder %s46_s11, %s647_s15  ;;  %p653_p12 = scmp.lt.s32.totalorder %s647_s15, %s647_s15 }
  0x1d   :  { %p654_p13 = por %p653_p12, %p652_p11 }
  0x1f   :  { %p655_p0 = pnand %p654_p13, %p648_p10 }
  0x21   :  { %658 = shalt.err (!%p655_p0)
}
  0x22   :  { %51 = dma.hbm_to_vmem [thread:$0]  %s792_s3, 1024, %s46_s11, [#allocation6], %s708_s27, %s708_s27, %s709_s28  }
  0x23   :  { %s712_s17 = smov [#allocation8]  }
  0x24   :  { %s59_s18 = sshll.u32 %s712_s17, 4  ;;  %s60_s18 = int_to_ptr.vmem [resolvable:$true] %s59_s18 }
  0x25   :  { %s667_s19 = scalar_lea.vmem %s60_s18, 2048  ;;  %p672_p2 = scmp.lt.s32.totalorder %s60_s18, %s60_s18 }
  0x26   :  { %p668_p1 = scmp.ne.s32.totalorder %s60_s18, %s667_s19  ;;  %p673_p3 = scmp.lt.s32.totalorder %s667_s19, %s667_s19 }
  0x28   :  { %p674_p4 = por %p673_p3, %p672_p2 }
  0x2a   :  { %p675_p5 = pnand %p674_p4, %p668_p1 }
  0x2c   :  { %678 = shalt.err (!%p675_p5)
}
  0x2d   :  { %65 = dma.hbm_to_vmem [thread:$0]  %s794_s5, 2048, %s60_s18, [#allocation9], %s708_s27, %s708_s27, %s709_s28  }
  0x2e   :  { %699 = dma.done.wait [#allocation3], 128  }
  0x2f   :  { %700 = vsyncadd [#allocation3], 4294967168 }
  0x30   :  { %701 = dma.done.wait [#allocation6], 1152  }
  0x31   :  { %702 = vsyncadd [#allocation6], 4294966144 }
  0x32   :  { %703 = dma.done.wait [#allocation9], 2048  }
  0x33   :  { %704 = vsyncadd [#allocation9], 4294965248  ;;  %v713_v0 = vmov 0.0   ;;  %vm714_vm0 = vmmov 0   ;;  %v568_v1 = vld [vmem:[#allocation5] sm:$0xff]   ;;  %v81_v2 = vld [vmem:[#allocation2] sm:$0xff]  ;;  %v449_v56 = vlaneseq }
  0x34   :  { %533 = vmatprep.subr.bf16.mxu0 %v713_v0  ;;  %535 = vmatprep.mubr.msk.bf16.mxu0 %vm714_vm0, %v713_v0  ;;  %v82_v3 = vpack.c.bf16 %v81_v2, %v81_v2  ;;  %vm98_vm1 = vcmask 130048   ;;  %v569_v4 = vld [vmem:[#allocation7 + $0x38] sm:$0xff]   ;;  %v570_v5 = vld [vmem:[#allocation7 + $0x30] sm:$0xff]   ;;  %v571_v6 = vld [vmem:[#allocation7 + $0x28] sm:$0xff]  }
  0x35   :  { %539 = vmatprep.subr.bf16.mxu1 %v713_v0  ;;  %555 = vmatprep.mubr.msk.bf16.mxu1 %vm714_vm0, %v713_v0  ;;  %v572_v7 = vld [vmem:[#allocation7 + $0x20] sm:$0xff]   ;;  %v573_v8 = vld [vmem:[#allocation7 + $0x18] sm:$0xff]   ;;  %v574_v9 = vld [vmem:[#allocation7 + $0x10] sm:$0xff]   ;;  %v450_v60 = vand.u32 127, %v449_v56 }
  0x36   :  { %534 = vmatpush3.bf16.msra.mxu0 %v568_v1  ;;  %540 = vmatpush3.bf16.msra.mxu1 %v569_v4  ;;  %v575_v10 = vld [vmem:[#allocation7 + $0x8] sm:$0xff]   ;;  %v576_v11 = vld [vmem:[#allocation7] sm:$0xff]   ;;  %v577_v12 = vld [vmem:[#allocation8 + $0x78] sm:$0xff]  }
  0x37   :  { %541 = vmatprep.subr.bf16.mxu1 %v713_v0  ;;  %v578_v13 = vld [vmem:[#allocation8 + $0x38] sm:$0xff]   ;;  %v579_v14 = vld [vmem:[#allocation8 + $0x70] sm:$0xff]   ;;  %511 = vmatprep.subr.bf16.mxu0 %v577_v12  ;;  %v581_v16 = vld [vmem:[#allocation8 + $0x68] sm:$0xff]   ;;  %vm451_vm4 = vcmp.lt.s32.totalorder %v450_v60, 2 }
  0x38   :  { %v580_v15 = vld [vmem:[#allocation8 + $0x30] sm:$0xff]   ;;  %v582_v17 = vld [vmem:[#allocation8 + $0x28] sm:$0xff]   ;;  %v583_v18 = vld [vmem:[#allocation8 + $0x60] sm:$0xff]  }
  0x39   :  { %536 = vmatmul.mubr.msk.bf16.vlgmr.msra.gmra.mxu0 %vm98_vm1, %v82_v3  ;;  %v584_v19 = vld [vmem:[#allocation8 + $0x20] sm:$0xff]   ;;  %v585_v20 = vld [vmem:[#allocation8 + $0x58] sm:$0xff]   ;;  %v587_v22 = vld [vmem:[#allocation8 + $0x50] sm:$0xff]  }
  0x3a   :  { %542 = vmatpush3.bf16.msra.mxu1 %v570_v5  ;;  %512 = vmatpush3.bf16.msra.mxu0 %v578_v13  ;;  %v586_v21 = vld [vmem:[#allocation8 + $0x18] sm:$0xff]   ;;  %v588_v23 = vld [vmem:[#allocation8 + $0x10] sm:$0xff]   ;;  %v589_v24 = vld [vmem:[#allocation8 + $0x48] sm:$0xff]  }
  0x3b   :  { %543 = vmatprep.subr.bf16.mxu1 %v713_v0  ;;  %513 = vmatprep.subr.bf16.mxu0 %v579_v14  ;;  %v471_v25 = vld [vmem:[%s791_s2] ss:$0 sm:$0xff]  ;;  %v590_v33 = vld [vmem:[#allocation8 + $0x8] sm:$0xff]   ;;  %v591_v34 = vld [vmem:[#allocation8 + $0x40] sm:$0xff]  }
  0x3c   :  { %v592_v35 = vld [vmem:[#allocation8] sm:$0xff]   ;;  %v474_v36 = vld [vmem:[%s793_s4] ss:$0 sm:$0xff]  ;;  %s715_s4 = smov [#allocation10]  }
  0x3d   :  { %v483_v45 = vld [vmem:[%s795_s6] ss:$0 sm:$0xff]  ;;  %s460_s6 = sshll.u32 %s715_s4, 4  ;;  %s461_s6 = int_to_ptr.vmem [resolvable:$true] %s460_s6 }
  0x3e   :  { %544 = vmatpush3.bf16.msra.mxu1 %v571_v6  ;;  %514 = vmatpush3.bf16.msra.mxu0 %v580_v15  ;;  %s679_s24 = scalar_lea.vmem %s461_s6, 128  ;;  %p684_p7 = scmp.lt.s32.totalorder %s461_s6, %s461_s6 }
  0x3f   :  { %545 = vmatprep.subr.bf16.mxu1 %v713_v0  ;;  %515 = vmatprep.subr.bf16.mxu0 %v581_v16  ;;  %p680_p6 = scmp.ne.s32.totalorder %s461_s6, %s679_s24  ;;  %p685_p8 = scmp.lt.s32.totalorder %s679_s24, %s679_s24 }
  0x41   :  { %p686_p9 = por %p685_p8, %p684_p7 }
  0x42   :  { %546 = vmatpush3.bf16.msra.mxu1 %v572_v7  ;;  %516 = vmatpush3.bf16.msra.mxu0 %v582_v17 }
  0x43   :  { %547 = vmatprep.subr.bf16.mxu1 %v713_v0  ;;  %517 = vmatprep.subr.bf16.mxu0 %v583_v18  ;;  %p687_p10 = pnand %p686_p9, %p680_p6 }
  0x46   :  { %548 = vmatpush3.bf16.msra.mxu1 %v573_v8  ;;  %518 = vmatpush3.bf16.msra.mxu0 %v584_v19 }
  0x47   :  { %549 = vmatprep.subr.bf16.mxu1 %v713_v0  ;;  %519 = vmatprep.subr.bf16.mxu0 %v585_v20 }
  0x4a   :  { %550 = vmatpush3.bf16.msra.mxu1 %v574_v9  ;;  %520 = vmatpush3.bf16.msra.mxu0 %v586_v21 }
  0x4b   :  { %551 = vmatprep.subr.bf16.mxu1 %v713_v0  ;;  %521 = vmatprep.subr.bf16.mxu0 %v587_v22 }
  0x4e   :  { %552 = vmatpush3.bf16.msra.mxu1 %v575_v10  ;;  %522 = vmatpush3.bf16.msra.mxu0 %v588_v23 }
  0x4f   :  { %553 = vmatprep.subr.bf16.mxu1 %v713_v0  ;;  %523 = vmatprep.subr.bf16.mxu0 %v589_v24 }
  0x52   :  { %554 = vmatpush3.bf16.msra.mxu1 %v576_v11  ;;  %524 = vmatpush3.bf16.msra.mxu0 %v590_v33 }
  0x53   :  { %525 = vmatprep.subr.bf16.mxu0 %v591_v34 }
  0x56   :  { %526 = vmatpush3.bf16.msra.mxu0 %v592_v35 }
  0xf9   :  { %v136_v26 = vpop.f32.mrf.mxu0 }
  0xfa   :  { %v137_v27 = vadd.f32 %v471_v25, %v136_v26 }
  0xfb   :  { %v537_v28 = vpop.f32.mrf.mxu0 }
  0xfc   :  { %v142_v29 = vmax.f32 %v137_v27, 0.0 }
  0xfd   :  { %v139_v30 = vpop.f32.mrf.mxu0 }
  0xfe   :  { %v143_v31 = vpack.c.bf16 %v142_v29, %v142_v29 }
  0xff   :  { %v538_v32 = vpop.f32.mrf.mxu0 }
 0x100   :  { %556 = vmatmul.mubr.bf16.vlgmr.msra.gmra.mxu1 %v143_v31  ;;  %424 = vmatprep.mubr.bf16.mxu0 %v143_v31 }
 0x1c0   :  { %v249_v37 = vpop.f32.mrf.mxu1 }
 0x1c1   :  { %v250_v38 = vadd.f32 %v474_v36, %v249_v37 }
 0x1c2   :  { %v557_v39 = vpop.f32.mrf.mxu1 }
 0x1c3   :  { %v255_v40 = vmax.f32 %v250_v38, 0.0 }
 0x1c4   :  { %v252_v41 = vpop.f32.mrf.mxu1 }
 0x1c5   :  { %v256_v42 = vpack.c.bf16 %v255_v40, %v255_v40 }
 0x1c6   :  { %v558_v43 = vpop.f32.mrf.mxu1 }
 0x1c7   :  { %425 = vmatmul.mubr.bf16.vlgmr.msra.gmra.mxu0 %v256_v42 }
 0x287   :  { %v527_v44 = vpop.f32.mrf.mxu0 }
 0x289   :  { %v528_v46 = vpop.f32.mrf.mxu0 }
 0x28a   :  { %v529_v47 = vadd.f32 %v528_v46, %v527_v44 }
 0x28b   :  { %v530_v48 = vpop.f32.mrf.mxu0 }
 0x28c   :  { %v427_v49 = vadd.f32 %v529_v47, %v483_v45 }
 0x28d   :  { %v531_v50 = vpop.f32.mrf.mxu0 }
 0x28e   :  { %v435_v51 = vmin.f32 %v427_v49, 20.0  ;;  %vm434_vm3 = vcmp.gt.f32.partialorder %v427_v49, 20.0 }
 0x290   :  { %v436_v52 = vmul.f32 1.442695, %v435_v51 }
 0x292   :  { %593 = vpow2.f32 %v436_v52 }
 0x29f   :  { %v594_v53 = vpop.eup %593 }
 0x2a0   :  { %v438_v54 = vadd.f32 1.0, %v594_v53  ;;  %v441_v55 = vmul.f32 -0.5, %v594_v53  ;;  %v444_v58 = vand.u32 2147483647, %v594_v53 }
 0x2a2   :  { %595 = vlog2.f32 %v438_v54  ;;  %v442_v57 = vadd.f32 1.0, %v441_v55  ;;  %vm445_vm2 = vcmp.lt.f32.partialorder %v444_v58, 0.0004427343 }
 0x2a3   :  { %597 = vtanh.f32 %v427_v49 }
 0x2a4   :  { %v443_v62 = vmul.f32 %v594_v53, %v442_v57 }
 0x2af   :  { %v596_v59 = vpop.eup %595 }
 0x2b0   :  { %v440_v61 = vmul.f32 0.6931472, %v596_v59  ;;  %v598_v63 = vpop.eup %597 }
 0x2b1   :  { %v433_v2 = vmul.f32 2.0, %v598_v63 }
 0x2b2   :  { %v446_v0 = vsel %vm445_vm2, %v443_v62, %v440_v61 }
 0x2b3   :  { %v447_v1 = vsel %vm434_vm3, %v427_v49, %v446_v0 }
 0x2b4   :  { %v448_v3 = vmax.f32 %v447_v1, 1e-05 }
 0x2b6   :  { %v452_v4 = vsel %vm451_vm4, %v433_v2, %v448_v3 }
 0x2b7   :  { %453 = vst [vmem:[#allocation10] sm:$0xff] %v452_v4 }
 0x2b8   :  { %690 = shalt.err (!%p687_p10)
}
 0x2b9   :  { %463 = dma.vmem_to_hbm [thread:$0]  %s461_s6, 128, %s796_s7, [#allocation4]  }
 0x2ba   :  { %705 = dma.done.wait [#allocation4], 128  }
 0x2bb   :  { %706 = vsyncadd [#allocation4], 4294967168 }
 0x2bc   :  { %467 = vsyncpa [#allocation3], 1 }
 0x2bd   :  { %468 = vsyncpa [#allocation6], 1 }
 0x2be   :  { %469 = vsyncpa [#allocation9], 1 }
 0x2bf   :  { %470 = vsyncpa [#allocation4], 1 }

</bundles_post_ra>
